<compile_context>
chip_gen: v7x
topology: tpu7x:2x2x1
jax: 0.10.0
libtpu: 0.0.40
codegen_flags: <defaults>
</compile_context>

<pallas_src>
import functools

import jax
import jax.numpy as jnp
from jax.experimental import pallas as pl
from jax.experimental.pallas import tpu as pltpu


def _round_up(a, m):
    return (a + m - 1) // m * m


def _tile_config(itemsize):
    """Generation-gated tile caps + VMEM limit (bytes)."""
    try:
        vmem = int(pltpu.get_tpu_info().vmem_capacity_bytes)
    except Exception:
        vmem = 64 << 20  # conservative: assume v7x-sized (64 MiB) VMEM
    if vmem >= (100 << 20):       # v5e / v6e: 128 MiB physical VMEM
        max_block_bytes = 16 << 20    # per input block
        vmem_limit = 96 << 20
    else:                         # v7x: 64 MiB physical VMEM
        max_block_bytes = 8 << 20
        vmem_limit = 48 << 20
    max_tc = 8192
    max_tr = max(8, max_block_bytes // (max_tc * itemsize))
    return max_tr, max_tc, vmem_limit


def _sqerr_row_sum_kernel(x_ref, t_ref, o_ref, acc_ref, *, scale, c_rem):
    k = pl.program_id(1)
    nk = pl.num_programs(1)

    @pl.when(k == 0)
    def _():
        acc_ref[...] = jnp.zeros_like(acc_ref)

    d = x_ref[...].astype(jnp.float32) - t_ref[...].astype(jnp.float32)

    def accumulate(dd):
        acc_ref[...] += jnp.sum(dd * dd, axis=1, keepdims=True)

    if c_rem:  # static: the reduction axis has a partial last block
        @pl.when(k == nk - 1)
        def _():
            # Edge-block contents beyond the valid columns are unspecified;
            # zero them before squaring so they contribute nothing.
            lane = jax.lax.broadcasted_iota(jnp.int32, d.shape, 1)
            accumulate(jnp.where(lane < c_rem, d, 0.0))

        @pl.when(k != nk - 1)
        def _():
            accumulate(d)
    else:
        accumulate(d)

    @pl.when(k == nk - 1)
    def _():
        # Fold mean-over-T and mean-over-B into a single scale at finalize.
        o_ref[...] = (acc_ref[...] * scale).astype(o_ref.dtype)


def squared_error(x, t):
    """SquaredError(sum_dim=2, mean_dim=3).forward(x, t, batch_mean=True)."""
    assert x.shape == t.shape and x.ndim == 4
    B, S, F, T = x.shape
    R, C = B * S, F * T

    itemsize = jnp.dtype(x.dtype).itemsize
    sub = 8 * max(1, 4 // itemsize)          # 8 (f32) / 16 (bf16) / 32 (8-bit)
    max_tr, max_tc, vmem_limit = _tile_config(itemsize)

    # Free, contiguous 2-D views with a lane-dense last axis.
    x2 = x.reshape(R, C)
    t2 = t.reshape(R, C)

    TR = min(_round_up(R, sub), max_tr)
    # v7x megacore: make the "parallel" row axis yield >= 2 blocks when R allows.
    if R > sub and pl.cdiv(R, TR) < 2:
        TR = _round_up(pl.cdiv(R, 2), sub)
    TC = min(_round_up(C, 128), max_tc)

    grid = (pl.cdiv(R, TR), pl.cdiv(C, TC))
    c_rem = C % TC                           # 0 => aligned, no in-kernel mask
    scale = 1.0 / float(B * T)

    kernel = functools.partial(
        _sqerr_row_sum_kernel, scale=scale, c_rem=int(c_rem))

    row_sums = pl.pallas_call(
        kernel,
        out_shape=jax.ShapeDtypeStruct((R, 1), jnp.float32),
        grid_spec=pltpu.PrefetchScalarGridSpec(
            num_scalar_prefetch=0,
            grid=grid,
            in_specs=[
                pl.BlockSpec((TR, TC), lambda i, k: (i, k)),
                pl.BlockSpec((TR, TC), lambda i, k: (i, k)),
            ],
            out_specs=pl.BlockSpec((TR, 1), lambda i, k: (i, 0)),
            scratch_shapes=[pltpu.VMEM((TR, 1), jnp.float32)],
        ),
        compiler_params=pltpu.CompilerParams(
            dimension_semantics=("parallel", "arbitrary"),
            vmem_limit_bytes=vmem_limit,
        ),
        cost_estimate=pl.CostEstimate(
            flops=3 * R * C,                          # sub, mul, add per elem
            transcendentals=0,
            bytes_accessed=2 * R * C * itemsize + 4 * R,
        ),
    )(x2, t2)

    # Tiny O(B*S) combine; rows were already scaled by 1/(B*T) in-kernel.
    return jnp.sum(row_sums.reshape(B, S), axis=0)


def squared_error_ref(x, t):
    # Pure-JAX reference mirroring the PyTorch module.
    loss = (x.astype(jnp.float32) - t.astype(jnp.float32)) ** 2
    loss = jnp.sum(loss, axis=2, keepdims=True)    # sum_dim=2, keepdim
    loss = jnp.mean(loss, axis=3, keepdims=True)   # mean_dim=3, keepdim
    loss = jnp.squeeze(loss, axis=(2, 3))          # squeeze reduced dims
    loss = jnp.mean(loss, axis=0)                  # batch_mean
    return loss


if __name__ == "__main__":
    key = jax.random.PRNGKey(0)
    k1, k2, k3, k4 = jax.random.split(key, 4)

    # Aligned case: F*T = 256 (multiple of 128 lanes), B*S = 8 sublanes.
    B, S, F, T = 2, 4, 16, 16
    x = jax.random.normal(k1, (B, S, F, T), dtype=jnp.float32)
    t = jax.random.normal(k2, (B, S, F, T), dtype=jnp.float32)
    out = jax.block_until_ready(squared_error(x, t))
    ref = squared_error_ref(x, t)
    assert out.shape == ref.shape == (S,)
    assert jnp.allclose(out, ref, rtol=1e-5, atol=1e-5), (out, ref)

    # Unaligned case: exercises the in-kernel lane-mask remainder path.
    B2, S2, F2, T2 = 2, 3, 10, 7
    x2 = jax.random.normal(k3, (B2, S2, F2, T2), dtype=jnp.float32)
    t2 = jax.random.normal(k4, (B2, S2, F2, T2), dtype=jnp.float32)
    out2 = jax.block_until_ready(squared_error(x2, t2))
    ref2 = squared_error_ref(x2, t2)
    assert out2.shape == ref2.shape == (S2,)
    assert jnp.allclose(out2, ref2, rtol=1e-5, atol=1e-5), (out2, ref2)

    # bf16 streaming path: same kernel, in-kernel f32 upcast, 16-sublane tile.
    xb = x.astype(jnp.bfloat16)
    tb = t.astype(jnp.bfloat16)
    out3 = jax.block_until_ready(squared_error(xb, tb))
    ref3 = squared_error_ref(xb, tb)
    assert out3.shape == ref3.shape == (S,)
    assert jnp.allclose(out3, ref3, rtol=1e-5, atol=1e-4), (out3, ref3)

    print("KERNEL_OK")
</pallas_src>

<mosaic_0001>
module attributes {stable_mosaic.version = 11 : i64} {
  func.func @_sqerr_row_sum_kernel(%arg0: i32, %arg1: i32, %arg2: memref<8x256xf32, #tpu.memory_space<vmem>>, %arg3: memref<8x256xf32, #tpu.memory_space<vmem>>, %arg4: memref<8x1xf32, #tpu.memory_space<vmem>>, %arg5: memref<8x1xf32, #tpu.memory_space<vmem>>) attributes {dimension_semantics = [#tpu.dimension_semantics<parallel>, #tpu.dimension_semantics<arbitrary>], iteration_bounds = array<i64: 1, 1>, scalar_prefetch = 0 : i64, scratch_operands = 1 : i64, tpu.core_type = #tpu.core_type<tc>, window_params = [{transform_indices = @transform_0, window_bounds = array<i64: 8, 256>}, {transform_indices = @transform_1, window_bounds = array<i64: 8, 256>}, {transform_indices = @transform_2, window_bounds = array<i64: 8, 1>}]} {
    %c0_i32 = arith.constant 0 : i32
    %0 = arith.cmpi eq, %arg1, %c0_i32 : i32
    %1 = arith.extui %0 : i1 to i32
    %c0_i32_0 = arith.constant 0 : i32
    %2 = arith.cmpi ne, %1, %c0_i32_0 : i32
    scf.if %2 {
      %cst_10 = arith.constant 0.000000e+00 : f32
      %15 = vector.broadcast %cst_10 : f32 to vector<8x1xf32>
      %c0_11 = arith.constant 0 : index
      %c0_12 = arith.constant 0 : index
      %16 = vector.load %arg5[%c0_11, %c0_12] : memref<8x1xf32, #tpu.memory_space<vmem>>, vector<8x1xf32>
      tpu.vector_store %arg5[%c0_11, %c0_12], %15 {strides = array<i32>} : memref<8x1xf32, #tpu.memory_space<vmem>>, vector<8x1xf32>,
    } else {
    }
    %c0 = arith.constant 0 : index
    %c0_1 = arith.constant 0 : index
    %3 = vector.load %arg2[%c0, %c0_1] : memref<8x256xf32, #tpu.memory_space<vmem>>, vector<8x256xf32>
    %c0_2 = arith.constant 0 : index
    %c0_3 = arith.constant 0 : index
    %4 = vector.load %arg3[%c0_2, %c0_3] : memref<8x256xf32, #tpu.memory_space<vmem>>, vector<8x256xf32>
    %5 = arith.subf %3, %4 : vector<8x256xf32>
    %c0_4 = arith.constant 0 : index
    %c0_5 = arith.constant 0 : index
    %6 = vector.load %arg5[%c0_4, %c0_5] : memref<8x1xf32, #tpu.memory_space<vmem>>, vector<8x1xf32>
    %7 = arith.mulf %5, %5 : vector<8x256xf32>
    %cst = arith.constant dense<0.000000e+00> : vector<8xf32>
    %8 = vector.multi_reduction <add>, %7, %cst [1] : vector<8x256xf32> to vector<8xf32>
    %9 = vector.shape_cast %8 : vector<8xf32> to vector<8x1xf32>
    %10 = arith.addf %6, %9 : vector<8x1xf32>
    %c0_6 = arith.constant 0 : index
    %c0_7 = arith.constant 0 : index
    %11 = vector.load %arg5[%c0_6, %c0_7] : memref<8x1xf32, #tpu.memory_space<vmem>>, vector<8x1xf32>
    tpu.vector_store %arg5[%c0_6, %c0_7], %10 {strides = array<i32>} : memref<8x1xf32, #tpu.memory_space<vmem>>, vector<8x1xf32>,
    %c0_i32_8 = arith.constant 0 : i32
    %12 = arith.cmpi eq, %arg1, %c0_i32_8 : i32
    %13 = arith.extui %12 : i1 to i32
    %c0_i32_9 = arith.constant 0 : i32
    %14 = arith.cmpi ne, %13, %c0_i32_9 : i32
    scf.if %14 {
      %c0_10 = arith.constant 0 : index
      %c0_11 = arith.constant 0 : index
      %15 = vector.load %arg5[%c0_10, %c0_11] : memref<8x1xf32, #tpu.memory_space<vmem>>, vector<8x1xf32>
      %cst_12 = arith.constant 3.125000e-02 : f32
      %16 = vector.broadcast %cst_12 : f32 to vector<8x1xf32>
      %17 = arith.mulf %15, %16 : vector<8x1xf32>
      %c0_13 = arith.constant 0 : index
      %c0_14 = arith.constant 0 : index
      %18 = vector.load %arg4[%c0_13, %c0_14] : memref<8x1xf32, #tpu.memory_space<vmem>>, vector<8x1xf32>
      tpu.vector_store %arg4[%c0_13, %c0_14], %17 {strides = array<i32>} : memref<8x1xf32, #tpu.memory_space<vmem>>, vector<8x1xf32>,
    } else {
    }
    return
  }
  func.func @transform_0(%arg0: i32, %arg1: i32) -> (i32, i32) {
    %c0_i32 = arith.constant 0 : i32
    return %arg0, %arg1 : i32, i32
  }
  func.func @transform_1(%arg0: i32, %arg1: i32) -> (i32, i32) {
    %c0_i32 = arith.constant 0 : i32
    return %arg0, %arg1 : i32, i32
  }
  func.func @transform_2(%arg0: i32, %arg1: i32) -> (i32, i32) {
    %c0_i32 = arith.constant 0 : i32
    %c0_i32_0 = arith.constant 0 : i32
    return %arg0, %c0_i32 : i32, i32
  }
}

</mosaic_0001>

<bundles_post_ra>
// kernel: tpu_custom_call.1
= control target key start
LH: loop header
LB: loop body
LE: loop exit
PB: predicated region body
PF: predicated region fallthrough
CT: control target
= control target key end

     0   :  { %7 = vsyncpa [#allocation4], 0  ;;  %s167_s0 = inlined_call_operand.hbm [shape: f32[8,256], index: 0, kind: input, shape index: {}]   ;;  %s168_s1 = inlined_call_operand.hbm [shape: f32[8,256], index: 1, kind: input, shape index: {}]   ;;  %s169_s2 = inlined_call_operand.vmem [shape: f32[8,1], index: 2, kind: output, shape index: {}]  }
   0x1   :  { %8 = vsyncpa [#allocation6], 0  ;;  %s119_s9 = smov [#allocation3]   ;;  %s120_s11 = smov [#allocation5]  }
   0x2   :  { %s15_s10 = sshll.u32 %s119_s9, 4  ;;  %s25_s12 = sshll.u32 %s120_s11, 4  ;;  %s16_s10 = int_to_ptr.vmem [resolvable:$true] %s15_s10  ;;  %s26_s12 = int_to_ptr.vmem [resolvable:$true] %s25_s12 }
   0x3   :  { %s71_s15 = scalar_lea.hbm %s167_s0, 256 }
   0x4   :  { %p72_p0 = scmp.ne.s32.totalorder %s167_s0, %s71_s15  ;;  %p75_p1 = scmp.lt.u32.totalorder %s71_s15, %s167_s0 }
   0x6   :  { %p77_p2 = pnand %p75_p1, %p72_p0 }
   0x8   :  { %80 = shalt.err (!%p77_p2)
}
   0x9   :  { %s81_s20 = scalar_lea.vmem %s16_s10, 256  ;;  %p86_p4 = scmp.lt.s32.totalorder %s16_s10, %s16_s10 }
   0xa   :  { %p82_p3 = scmp.ne.s32.totalorder %s16_s10, %s81_s20  ;;  %p87_p5 = scmp.lt.s32.totalorder %s81_s20, %s81_s20 }
   0xc   :  { %p88_p6 = por %p87_p5, %p86_p4 }
   0xe   :  { %p89_p7 = pnand %p88_p6, %p82_p3 }
  0x10   :  { %92 = shalt.err (!%p89_p7)
}
  0x11   :  { %18 = dma.hbm_to_vmem [thread:$0]  %s167_s0, 256, %s16_s10, [#allocation4]  }
  0x12   :  { %s93_s25 = scalar_lea.hbm %s168_s1, 256 }
  0x13   :  { %p94_p8 = scmp.ne.s32.totalorder %s168_s1, %s93_s25  ;;  %p97_p9 = scmp.lt.u32.totalorder %s93_s25, %s168_s1 }
  0x15   :  { %p99_p10 = pnand %p97_p9, %p94_p8 }
  0x17   :  { %102 = shalt.err (!%p99_p10)
}
  0x18   :  { %s103_s30 = scalar_lea.vmem %s26_s12, 256  ;;  %p108_p12 = scmp.lt.s32.totalorder %s26_s12, %s26_s12 }
  0x19   :  { %p104_p11 = scmp.ne.s32.totalorder %s26_s12, %s103_s30  ;;  %p109_p13 = scmp.lt.s32.totalorder %s103_s30, %s103_s30 }
  0x1b   :  { %p110_p0 = por %p109_p13, %p108_p12 }
  0x1d   :  { %p111_p1 = pnand %p110_p0, %p104_p11 }
  0x1f   :  { %114 = shalt.err (!%p111_p1)
}
  0x20   :  { %28 = dma.hbm_to_vmem [thread:$0]  %s168_s1, 256, %s26_s12, [#allocation6]  }
  0x21   :  { %115 = dma.done.wait [#allocation4], 256  }
  0x22   :  { %116 = vsyncadd [#allocation4], 4294967040 }
  0x23   :  { %117 = dma.done.wait [#allocation6], 256  }
  0x24   :  { %118 = vsyncadd [#allocation6], 4294967040  ;;  %vm39_vm0 = vcmask 7168   ;;  %v121_v0 = vmov 0.0   ;;  %v41_v1 = vld [vmem:[#allocation3] sm:$0xff]  ;;  %v42_v2 = vld [vmem:[#allocation3 + $0x8] sm:$0xff] }
  0x25   :  { %40 = vst.msk [vmem:[#allocation2] sm:$0xff] %vm39_vm0, %v121_v0  ;;  %v43_v3 = vld [vmem:[#allocation5] sm:$0xff]  ;;  %v44_v4 = vld [vmem:[#allocation5 + $0x8] sm:$0xff] }
  0x26   :  { %v45_v5 = vsub.f32 %v41_v1, %v43_v3  ;;  %v46_v6 = vsub.f32 %v42_v2, %v44_v4 }
  0x28   :  { %v48_v7 = vmul.f32 %v45_v5, %v45_v5  ;;  %v49_v8 = vmul.f32 %v46_v6, %v46_v6 }
  0x2a   :  { %v50_v9 = vadd.f32 %v49_v8, %v48_v7 }
  0x2c   :  { %51 = vadd.xlane.f32.xlu0 %v50_v9  ;;  %v47_v10 = vld [vmem:[#allocation2] sm:$0xff] }
  0xb9   :  { %v52_v11 = vpop.xlane.xlu0 %51 }
  0xba   :  { %v53_v12 = vadd.f32 %v52_v11, %v47_v10 }
  0xbc   :  { %55 = vst.msk [vmem:[#allocation2] sm:$0xff] %vm39_vm0, %v53_v12 }
  0xc3   :  { %v59_v13 = vld [vmem:[#allocation2] sm:$0xff] }
  0xc4   :  { %v60_v14 = vmul.f32 0.03125, %v59_v13 }
  0xc6   :  { %61 = vst.msk [vmem:[%s169_s2] sm:$0xff] %vm39_vm0, %v60_v14 }
  0xc7   :  { %66 = vsyncpa [#allocation4], 1 }
  0xc8   :  { %67 = vsyncpa [#allocation6], 1 }

</bundles_post_ra>
